<compile_context>
chip_gen: v7x
topology: tpu7x:2x2x1
jax: 0.10.0
libtpu: 0.0.40
codegen_flags: <defaults>
</compile_context>

<pallas_src>
import jax
import jax.numpy as jnp
from jax.experimental import pallas as pl
from jax.experimental.pallas import tpu as pltpu


# ----------------------------- fused kernel --------------------------------
def _resblock_kernel(x_ref, w1s_ref, w1c_ref, w2_ref,
                     shift1_ref, shift2_ref, bm_ref,
                     o_ref, pad1_ref, pad2_ref):
    # x_ref:      (Bt, H, W*Cin)              f32 input images (C packed with W on lanes)
    # w1s_ref:    (2, W*Cin, W*Cmid)    bf16  conv1 row-tap band mats, dy=0 and dy=2 (BN1 folded)
    # w1c_ref:    (W*Cin, W*Cmid+W*Cout) bf16 [conv1 dy=1 band | 1x1 shortcut] fused along N
    # w2_ref:     (3, W*Cmid, W*Cout)   bf16  conv2 row-tap band mats (BN2 folded)
    # shift1_ref: (1, W*Cmid) f32;  shift2_ref / bm_ref: (1, W*Cout) f32
    # o_ref:      (Bt, H, W*Cout)
    # pad1_ref:   (Bt*(H+2), W*Cin)  f32 scratch — images stacked along M with 1-row zero halos
    # pad2_ref:   (Bt*(H+2), W*Cmid) f32 scratch
    bt, hh = o_ref.shape[0], o_ref.shape[1]
    hp = hh + 2                       # padded rows per image
    m = bt * hp                       # slab rows
    mv = m - 2                        # matmul M: "valid" conv rows over the whole slab
    wcin = pad1_ref.shape[1]
    wcmid = pad2_ref.shape[1]

    # Zero only the halo rows (2 per image, per scratch); interiors are fully
    # rewritten every step.
    z1 = jnp.zeros((1, wcin), jnp.float32)
    z2 = jnp.zeros((1, wcmid), jnp.float32)
    for b in range(bt):
        pad1_ref[b * hp:b * hp + 1, :] = z1
        pad1_ref[b * hp + hh + 1:b * hp + hh + 2, :] = z1
        pad2_ref[b * hp:b * hp + 1, :] = z2
        pad2_ref[b * hp + hh + 1:b * hp + hh + 2, :] = z2
        pad1_ref[b * hp + 1:b * hp + 1 + hh, :] = x_ref[b]

    def tap(src_ref, dy, wmat):
        lhs = src_ref[dy:dy + mv, :].astype(jnp.bfloat16)   # bf16 MXU feed
        return jnp.dot(lhs, wmat, preferred_element_type=jnp.float32)

    # ---- conv1 (3x3, pad=1) + BN1 + ReLU, fused with the 1x1 shortcut -------
    # Center tap (dy=1) LHS is exactly the un-shifted image rows, so the 1x1
    # channel-matching conv rides along as extra N columns (N = 256 here).
    yc = tap(pad1_ref, 1, w1c_ref[...])                     # (mv, W*Cmid + W*Cout)
    acc1 = yc[:, :wcmid]                                    # conv1 center-tap output
    res = yc[:, wcmid:] + bm_ref[...]                       # shortcut conv + bias
    acc1 = acc1 + tap(pad1_ref, 0, w1s_ref[0])
    acc1 = acc1 + tap(pad1_ref, 2, w1s_ref[1])
    h1 = jnp.maximum(acc1 + shift1_ref[...], 0.0)           # (mv, W*Cmid)
    # Dropout2d is identity at inference time.
    # TODO(synk): training-mode Dropout2d / batch-statistics BatchNorm not implemented.

    # ---- conv2 (3x3, pad=1) + BN2 + ReLU -------------------------------------
    for b in range(bt):
        pad2_ref[b * hp + 1:b * hp + 1 + hh, :] = h1[b * hp:b * hp + hh, :]
    acc2 = tap(pad2_ref, 0, w2_ref[0])
    acc2 = acc2 + tap(pad2_ref, 1, w2_ref[1])
    acc2 = acc2 + tap(pad2_ref, 2, w2_ref[2])
    h2 = jnp.maximum(acc2 + shift2_ref[...], 0.0)           # (mv, W*Cout)

    # ---- skip add + final ReLU; drop the 2 seam rows between images ---------
    out = jnp.maximum(h2 + res, 0.0)
    for b in range(bt):
        o_ref[b] = out[b * hp:b * hp + hh, :].astype(o_ref.dtype)


# ------------------------- weight preprocessing ----------------------------
def _fold_bn(w_oihw, gamma, beta, mean, var, eps):
    scale = gamma / jnp.sqrt(var + eps)                     # (Cout,)
    shift = beta - mean * scale
    return w_oihw * scale[:, None, None, None], shift


def _band_weights(w_oihw, width):
    """3x3 conv (pad=1) as 3 per-row-tap band matrices (3, W*Cin, W*Cout), bf16.

    mats[dy][wi*Cin+ci, wo*Cout+co] = w[co, ci, dy, wi-wo+1] if 0 <= wi-wo+1 < 3
    else 0.  dx taps and W-direction zero padding are folded into the matrix.
    """
    c_out, c_in, kh, kw = w_oihw.shape
    w_hwio = jnp.transpose(w_oihw, (2, 3, 1, 0))            # (kh, kw, Cin, Cout)
    wi = jnp.arange(width)[:, None]
    wo = jnp.arange(width)[None, :]
    dx = wi - wo + (kw // 2)                                # (W, W)
    valid = (dx >= 0) & (dx < kw)
    dx_c = jnp.clip(dx, 0, kw - 1)
    mats = []
    for dy in range(kh):
        mm = w_hwio[dy][dx_c]                               # (W, W, Cin, Cout)
        mm = jnp.where(valid[:, :, None, None], mm, 0.0)
        mm = jnp.transpose(mm, (0, 2, 1, 3))                # (W, Cin, W, Cout)
        mats.append(mm.reshape(width * c_in, width * c_out))
    return jnp.stack(mats, axis=0).astype(jnp.bfloat16)


def _blockdiag_1x1(w_io, width):
    """1x1 conv as a block-diagonal (W*Cin, W*Cout) bf16 matrix."""
    c_in, c_out = w_io.shape
    eye = jnp.eye(width, dtype=w_io.dtype)
    mm = jnp.einsum('pq,io->piqo', eye, w_io)               # (W, Cin, W, Cout)
    return mm.reshape(width * c_in, width * c_out).astype(jnp.bfloat16)


def make_residual_block_params(w1, g1, b1, m1, v1, w2, g2, b2, m2, v2, wm, bm,
                               width, eps=1e-5):
    """Precompute fused matmul weights ONCE per weight set (hoisted out of the
    per-call forward)."""
    c_mid, c_in = w1.shape[0], w1.shape[1]
    c_out = w2.shape[0]
    assert width * max(c_in, c_mid, c_out) <= 1024, (
        "band formulation is O(W^2); tile the W axis for larger widths")

    w1f, shift1 = _fold_bn(w1.astype(jnp.float32), g1, b1, m1, v1, eps)
    w2f, shift2 = _fold_bn(w2.astype(jnp.float32), g2, b2, m2, v2, eps)
    w1_band = _band_weights(w1f, width)                     # (3, W*Cin,  W*Cmid)
    w2_band = _band_weights(w2f, width)                     # (3, W*Cmid, W*Cout)

    if wm is None:                                          # identity shortcut (Cin == Cout)
        w_io = jnp.eye(c_in, dtype=jnp.float32)
        bias_m = jnp.zeros((c_out,), jnp.float32)
    else:
        w_io = jnp.transpose(wm[:, :, 0, 0], (1, 0)).astype(jnp.float32)
        bias_m = bm.astype(jnp.float32)
    wm_blk = _blockdiag_1x1(w_io, width)                    # (W*Cin, W*Cout)

    return dict(
        # conv1 side taps (dy=0,2) and [center tap | 1x1 shortcut] fused along N.
        w1_side=jnp.stack([w1_band[0], w1_band[2]], axis=0),
        w1_center=jnp.concatenate([w1_band[1], wm_blk], axis=1),
        w2_band=w2_band,
        shift1=jnp.tile(shift1.astype(jnp.float32), width).reshape(1, width * c_mid),
        shift2=jnp.tile(shift2.astype(jnp.float32), width).reshape(1, width * c_out),
        bias_m=jnp.tile(bias_m, width).reshape(1, width * c_out),
    )


# ------------------------------- forward -----------------------------------
def _pick_batch_tile(batch, height, target_rows=512):
    """Largest divisor of batch whose padded slab (Bt*(H+2) rows) <= target_rows."""
    best = 1
    for d in range(1, batch + 1):
        if batch % d == 0 and d * (height + 2) <= target_rows:
            best = d
    return best


@jax.jit
def residual_block_apply_nhwc(params, x_nhwc):
    """ResidualBlock forward, NHWC layout: (B, H, W, Cin) -> (B, H, W, Cout)."""
    B, H, W, Cin = x_nhwc.shape
    w1_side, w1_center = params["w1_side"], params["w1_center"]
    w2_band = params["w2_band"]
    wcin = W * Cin
    wcmid = w1_side.shape[2]
    wcout = w2_band.shape[2]
    assert w1_side.shape[1] == wcin and w1_center.shape == (wcin, wcmid + wcout)
    cout = wcout // W

    bt = _pick_batch_tile(B, H)                 # images per grid step (M batching)
    grid = (B // bt,)

    x_packed = x_nhwc.reshape(B, H, wcin)       # free reshape: pack C with W on lanes

    out_packed = pl.pallas_call(
        _resblock_kernel,
        out_shape=jax.ShapeDtypeStruct((B, H, wcout), x_nhwc.dtype),
        grid_spec=pltpu.PrefetchScalarGridSpec(
            num_scalar_prefetch=0,
            grid=grid,
            in_specs=[
                pl.BlockSpec((bt, H, wcin), lambda g: (g, 0, 0)),
                pl.BlockSpec((2, wcin, wcmid), lambda g: (0, 0, 0)),
                pl.BlockSpec((wcin, wcmid + wcout), lambda g: (0, 0)),
                pl.BlockSpec((3, wcmid, wcout), lambda g: (0, 0, 0)),
                pl.BlockSpec((1, wcmid), lambda g: (0, 0)),
                pl.BlockSpec((1, wcout), lambda g: (0, 0)),
                pl.BlockSpec((1, wcout), lambda g: (0, 0)),
            ],
            out_specs=pl.BlockSpec((bt, H, wcout), lambda g: (g, 0, 0)),
            scratch_shapes=[
                pltpu.VMEM((bt * (H + 2), wcin), jnp.float32),
                pltpu.VMEM((bt * (H + 2), wcmid), jnp.float32),
            ],
        ),
        compiler_params=pltpu.CompilerParams(
            dimension_semantics=("parallel",)),
    )(x_packed, w1_side, w1_center, w2_band,
      params["shift1"], params["shift2"], params["bias_m"])

    return out_packed.reshape(B, H, W, cout)


def residual_block_forward(x_nchw, params):
    """PyTorch-layout (NCHW) convenience wrapper."""
    x_nhwc = jnp.transpose(x_nchw, (0, 2, 3, 1))
    out_nhwc = residual_block_apply_nhwc(params, x_nhwc)
    return jnp.transpose(out_nhwc, (0, 3, 1, 2))


# ----------------------- pure-JAX reference (NCHW) --------------------------
def _ref_convblock(x, w, gamma, beta, mean, var, eps=1e-5):
    y = jax.lax.conv_general_dilated(
        x, w, window_strides=(1, 1), padding=((1, 1), (1, 1)),
        dimension_numbers=("NCHW", "OIHW", "NCHW"),
        precision=jax.lax.Precision.HIGHEST)
    scale = (gamma / jnp.sqrt(var + eps)).reshape(1, -1, 1, 1)
    shift = (beta - mean * gamma / jnp.sqrt(var + eps)).reshape(1, -1, 1, 1)
    return jnp.maximum(y * scale + shift, 0.0)


def _ref_residual_block(x, w1, g1, b1, m1, v1, w2, g2, b2, m2, v2, wm, bm,
                        eps=1e-5):
    h = _ref_convblock(x, w1, g1, b1, m1, v1, eps)
    h = _ref_convblock(h, w2, g2, b2, m2, v2, eps)
    res = jax.lax.conv_general_dilated(
        x, wm, window_strides=(1, 1), padding=((0, 0), (0, 0)),
        dimension_numbers=("NCHW", "OIHW", "NCHW"),
        precision=jax.lax.Precision.HIGHEST) + bm.reshape(1, -1, 1, 1)
    return jnp.maximum(h + res, 0.0)


if __name__ == "__main__":
    B, Cin, Cout, H, W = 2, 4, 8, 16, 16      # W * Cout = 128 -> lane-dense output

    key = jax.random.PRNGKey(0)
    keys = jax.random.split(key, 12)

    x = jax.random.normal(keys[0], (B, Cin, H, W), dtype=jnp.float32)

    # ConvBlock 1: Conv2d(Cin, Cout, 3, padding=1, bias=False) + BatchNorm2d.
    w1 = jax.random.normal(keys[1], (Cout, Cin, 3, 3), dtype=jnp.float32) * 0.1
    g1 = 1.0 + 0.1 * jax.random.normal(keys[2], (Cout,), dtype=jnp.float32)
    b1 = 0.1 * jax.random.normal(keys[3], (Cout,), dtype=jnp.float32)
    m1 = 0.1 * jax.random.normal(keys[4], (Cout,), dtype=jnp.float32)
    v1 = 1.0 + 0.1 * jax.random.uniform(keys[5], (Cout,), dtype=jnp.float32)

    # ConvBlock 2: Conv2d(Cout, Cout, 3, padding=1, bias=False) + BatchNorm2d.
    w2 = jax.random.normal(keys[6], (Cout, Cout, 3, 3), dtype=jnp.float32) * 0.1
    g2 = 1.0 + 0.1 * jax.random.normal(keys[7], (Cout,), dtype=jnp.float32)
    b2 = 0.1 * jax.random.normal(keys[8], (Cout,), dtype=jnp.float32)
    m2 = 0.1 * jax.random.normal(keys[9], (Cout,), dtype=jnp.float32)
    v2 = 1.0 + 0.1 * jax.random.uniform(keys[10], (Cout,), dtype=jnp.float32)

    # channel_matching_conv: Conv2d(Cin, Cout, kernel_size=1) WITH bias.
    wm = jax.random.normal(keys[11], (Cout, Cin, 1, 1), dtype=jnp.float32) * 0.3
    bm = 0.1 * jnp.arange(Cout, dtype=jnp.float32)

    # Weight preprocessing hoisted out of the per-call forward (done once).
    params = make_residual_block_params(w1, g1, b1, m1, v1,
                                        w2, g2, b2, m2, v2, wm, bm, width=W)

    out = residual_block_forward(x, params)
    out = jax.block_until_ready(out)

    ref = _ref_residual_block(x, w1, g1, b1, m1, v1, w2, g2, b2, m2, v2, wm, bm)
    assert out.shape == (B, Cout, H, W)
    err = float(jnp.max(jnp.abs(out - ref)))
    # bf16 MXU inputs (f32 accumulation): tolerance loosened vs the f32 kernel.
    assert jnp.allclose(out, ref, atol=1e-1, rtol=5e-2), (
        f"mismatch vs reference, max abs err = {err}")

    print("KERNEL_OK")
</pallas_src>

<mosaic_0001>
module attributes {stable_mosaic.version = 11 : i64} {
  func.func @_resblock_kernel(%arg0: i32, %arg1: memref<2x16x64xf32, #tpu.memory_space<vmem>>, %arg2: memref<2x64x128xbf16, #tpu.memory_space<vmem>>, %arg3: memref<64x256xbf16, #tpu.memory_space<vmem>>, %arg4: memref<3x128x128xbf16, #tpu.memory_space<vmem>>, %arg5: memref<1x128xf32, #tpu.memory_space<vmem>>, %arg6: memref<1x128xf32, #tpu.memory_space<vmem>>, %arg7: memref<1x128xf32, #tpu.memory_space<vmem>>, %arg8: memref<2x16x128xf32, #tpu.memory_space<vmem>>, %arg9: memref<36x64xf32, #tpu.memory_space<vmem>>, %arg10: memref<36x128xf32, #tpu.memory_space<vmem>>) attributes {dimension_semantics = [#tpu.dimension_semantics<parallel>], iteration_bounds = array<i64: 1>, scalar_prefetch = 0 : i64, scratch_operands = 2 : i64, tpu.core_type = #tpu.core_type<tc>, window_params = [{transform_indices = @transform_0, window_bounds = array<i64: 2, 16, 64>}, {pipeline_mode = #tpu.pipeline_mode<synchronous>, transform_indices = @transform_1, window_bounds = array<i64: 2, 64, 128>}, {pipeline_mode = #tpu.pipeline_mode<synchronous>, transform_indices = @transform_2, window_bounds = array<i64: 64, 256>}, {pipeline_mode = #tpu.pipeline_mode<synchronous>, transform_indices = @transform_3, window_bounds = array<i64: 3, 128, 128>}, {pipeline_mode = #tpu.pipeline_mode<synchronous>, transform_indices = @transform_4, window_bounds = array<i64: 1, 128>}, {pipeline_mode = #tpu.pipeline_mode<synchronous>, transform_indices = @transform_5, window_bounds = array<i64: 1, 128>}, {pipeline_mode = #tpu.pipeline_mode<synchronous>, transform_indices = @transform_6, window_bounds = array<i64: 1, 128>}, {transform_indices = @transform_7, window_bounds = array<i64: 2, 16, 128>}]} {
    %cst = arith.constant 0.000000e+00 : f32
    %0 = vector.broadcast %cst : f32 to vector<1x64xf32>
    %cst_0 = arith.constant 0.000000e+00 : f32
    %1 = vector.broadcast %cst_0 : f32 to vector<1x128xf32>
    %c0 = arith.constant 0 : index
    %c0_1 = arith.constant 0 : index
    %2 = vector.load %arg9[%c0, %c0_1] : memref<36x64xf32, #tpu.memory_space<vmem>>, vector<1x64xf32>
    tpu.vector_store %arg9[%c0, %c0_1], %0 {strides = array<i32>} : memref<36x64xf32, #tpu.memory_space<vmem>>, vector<1x64xf32>,
    %c17 = arith.constant 17 : index
    %c0_2 = arith.constant 0 : index
    %3 = vector.load %arg9[%c17, %c0_2] : memref<36x64xf32, #tpu.memory_space<vmem>>, vector<1x64xf32>
    tpu.vector_store %arg9[%c17, %c0_2], %0 {strides = array<i32>} : memref<36x64xf32, #tpu.memory_space<vmem>>, vector<1x64xf32>,
    %c0_3 = arith.constant 0 : index
    %c0_4 = arith.constant 0 : index
    %4 = vector.load %arg10[%c0_3, %c0_4] : memref<36x128xf32, #tpu.memory_space<vmem>>, vector<1x128xf32>
    tpu.vector_store %arg10[%c0_3, %c0_4], %1 {strides = array<i32>} : memref<36x128xf32, #tpu.memory_space<vmem>>, vector<1x128xf32>,
    %c17_5 = arith.constant 17 : index
    %c0_6 = arith.constant 0 : index
    %5 = vector.load %arg10[%c17_5, %c0_6] : memref<36x128xf32, #tpu.memory_space<vmem>>, vector<1x128xf32>
    tpu.vector_store %arg10[%c17_5, %c0_6], %1 {strides = array<i32>} : memref<36x128xf32, #tpu.memory_space<vmem>>, vector<1x128xf32>,
    %c0_7 = arith.constant 0 : index
    %c0_8 = arith.constant 0 : index
    %c0_9 = arith.constant 0 : index
    %6 = vector.load %arg1[%c0_7, %c0_8, %c0_9] : memref<2x16x64xf32, #tpu.memory_space<vmem>>, vector<1x16x64xf32>
    %7 = vector.shape_cast %6 : vector<1x16x64xf32> to vector<16x64xf32>
    %c1 = arith.constant 1 : index
    %c0_10 = arith.constant 0 : index
    %8 = vector.load %arg9[%c1, %c0_10] : memref<36x64xf32, #tpu.memory_space<vmem>>, vector<16x64xf32>
    tpu.vector_store %arg9[%c1, %c0_10], %7 {strides = array<i32>} : memref<36x64xf32, #tpu.memory_space<vmem>>, vector<16x64xf32>,
    %c18 = arith.constant 18 : index
    %c0_11 = arith.constant 0 : index
    %9 = vector.load %arg9[%c18, %c0_11] : memref<36x64xf32, #tpu.memory_space<vmem>>, vector<1x64xf32>
    tpu.vector_store %arg9[%c18, %c0_11], %0 {strides = array<i32>} : memref<36x64xf32, #tpu.memory_space<vmem>>, vector<1x64xf32>,
    %c35 = arith.constant 35 : index
    %c0_12 = arith.constant 0 : index
    %10 = vector.load %arg9[%c35, %c0_12] : memref<36x64xf32, #tpu.memory_space<vmem>>, vector<1x64xf32>
    tpu.vector_store %arg9[%c35, %c0_12], %0 {strides = array<i32>} : memref<36x64xf32, #tpu.memory_space<vmem>>, vector<1x64xf32>,
    %c18_13 = arith.constant 18 : index
    %c0_14 = arith.constant 0 : index
    %11 = vector.load %arg10[%c18_13, %c0_14] : memref<36x128xf32, #tpu.memory_space<vmem>>, vector<1x128xf32>
    tpu.vector_store %arg10[%c18_13, %c0_14], %1 {strides = array<i32>} : memref<36x128xf32, #tpu.memory_space<vmem>>, vector<1x128xf32>,
    %c35_15 = arith.constant 35 : index
    %c0_16 = arith.constant 0 : index
    %12 = vector.load %arg10[%c35_15, %c0_16] : memref<36x128xf32, #tpu.memory_space<vmem>>, vector<1x128xf32>
    tpu.vector_store %arg10[%c35_15, %c0_16], %1 {strides = array<i32>} : memref<36x128xf32, #tpu.memory_space<vmem>>, vector<1x128xf32>,
    %c1_17 = arith.constant 1 : index
    %c0_18 = arith.constant 0 : index
    %c0_19 = arith.constant 0 : index
    %13 = vector.load %arg1[%c1_17, %c0_18, %c0_19] : memref<2x16x64xf32, #tpu.memory_space<vmem>>, vector<1x16x64xf32>
    %14 = vector.shape_cast %13 : vector<1x16x64xf32> to vector<16x64xf32>
    %c19 = arith.constant 19 : index
    %c0_20 = arith.constant 0 : index
    %15 = vector.load %arg9[%c19, %c0_20] : memref<36x64xf32, #tpu.memory_space<vmem>>, vector<16x64xf32>
    tpu.vector_store %arg9[%c19, %c0_20], %14 {strides = array<i32>} : memref<36x64xf32, #tpu.memory_space<vmem>>, vector<16x64xf32>,
    %c0_21 = arith.constant 0 : index
    %c0_22 = arith.constant 0 : index
    %16 = vector.load %arg3[%c0_21, %c0_22] : memref<64x256xbf16, #tpu.memory_space<vmem>>, vector<64x256xbf16>
    %c1_23 = arith.constant 1 : index
    %c0_24 = arith.constant 0 : index
    %17 = vector.load %arg9[%c1_23, %c0_24] : memref<36x64xf32, #tpu.memory_space<vmem>>, vector<34x64xf32>
    %18 = arith.truncf %17 : vector<34x64xf32> to vector<34x64xbf16>
    %cst_25 = arith.constant dense<0.000000e+00> : vector<34x256xf32>
    %19 = tpu.matmul %18, %16, %cst_25 {dimension_numbers = #tpu.dot_dimension_numbers<[1], [0], [0], [1], [0, 0, 1, 1], [], []>} : vector<34x64xbf16>, vector<64x256xbf16>, vector<34x256xf32> -> vector<34x256xf32>
    %20 = vector.extract_strided_slice %19 {offsets = [0, 0], sizes = [34, 128], strides = [1, 1]} : vector<34x256xf32> to vector<34x128xf32>
    %21 = vector.extract_strided_slice %19 {offsets = [0, 128], sizes = [34, 128], strides = [1, 1]} : vector<34x256xf32> to vector<34x128xf32>
    %c0_26 = arith.constant 0 : index
    %c0_27 = arith.constant 0 : index
    %22 = vector.load %arg7[%c0_26, %c0_27] : memref<1x128xf32, #tpu.memory_space<vmem>>, vector<1x128xf32>
    %23 = vector.broadcast %22 : vector<1x128xf32> to vector<34x128xf32>
    %24 = arith.addf %21, %23 : vector<34x128xf32>
    %c0_28 = arith.constant 0 : index
    %c0_29 = arith.constant 0 : index
    %c0_30 = arith.constant 0 : index
    %25 = vector.load %arg2[%c0_28, %c0_29, %c0_30] : memref<2x64x128xbf16, #tpu.memory_space<vmem>>, vector<1x64x128xbf16>
    %26 = vector.shape_cast %25 : vector<1x64x128xbf16> to vector<64x128xbf16>
    %c0_31 = arith.constant 0 : index
    %c0_32 = arith.constant 0 : index
    %27 = vector.load %arg9[%c0_31, %c0_32] : memref<36x64xf32, #tpu.memory_space<vmem>>, vector<34x64xf32>
    %28 = arith.truncf %27 : vector<34x64xf32> to vector<34x64xbf16>
    %cst_33 = arith.constant dense<0.000000e+00> : vector<34x128xf32>
    %29 = tpu.matmul %28, %26, %cst_33 {dimension_numbers = #tpu.dot_dimension_numbers<[1], [0], [0], [1], [0, 0, 1, 1], [], []>} : vector<34x64xbf16>, vector<64x128xbf16>, vector<34x128xf32> -> vector<34x128xf32>
    %30 = arith.addf %20, %29 : vector<34x128xf32>
    %c1_34 = arith.constant 1 : index
    %c0_35 = arith.constant 0 : index
    %c0_36 = arith.constant 0 : index
    %31 = vector.load %arg2[%c1_34, %c0_35, %c0_36] : memref<2x64x128xbf16, #tpu.memory_space<vmem>>, vector<1x64x128xbf16>
    %32 = vector.shape_cast %31 : vector<1x64x128xbf16> to vector<64x128xbf16>
    %c2 = arith.constant 2 : index
    %c0_37 = arith.constant 0 : index
    %33 = vector.load %arg9[%c2, %c0_37] : memref<36x64xf32, #tpu.memory_space<vmem>>, vector<34x64xf32>
    %34 = arith.truncf %33 : vector<34x64xf32> to vector<34x64xbf16>
    %cst_38 = arith.constant dense<0.000000e+00> : vector<34x128xf32>
    %35 = tpu.matmul %34, %32, %cst_38 {dimension_numbers = #tpu.dot_dimension_numbers<[1], [0], [0], [1], [0, 0, 1, 1], [], []>} : vector<34x64xbf16>, vector<64x128xbf16>, vector<34x128xf32> -> vector<34x128xf32>
    %36 = arith.addf %30, %35 : vector<34x128xf32>
    %c0_39 = arith.constant 0 : index
    %c0_40 = arith.constant 0 : index
    %37 = vector.load %arg5[%c0_39, %c0_40] : memref<1x128xf32, #tpu.memory_space<vmem>>, vector<1x128xf32>
    %38 = vector.broadcast %37 : vector<1x128xf32> to vector<34x128xf32>
    %39 = arith.addf %36, %38 : vector<34x128xf32>
    %cst_41 = arith.constant 0.000000e+00 : f32
    %40 = vector.broadcast %cst_41 : f32 to vector<34x128xf32>
    %41 = arith.maximumf %39, %40 : vector<34x128xf32>
    %42 = vector.extract_strided_slice %41 {offsets = [0, 0], sizes = [16, 128], strides = [1, 1]} : vector<34x128xf32> to vector<16x128xf32>
    %c1_42 = arith.constant 1 : index
    %c0_43 = arith.constant 0 : index
    %43 = vector.load %arg10[%c1_42, %c0_43] : memref<36x128xf32, #tpu.memory_space<vmem>>, vector<16x128xf32>
    tpu.vector_store %arg10[%c1_42, %c0_43], %42 {strides = array<i32>} : memref<36x128xf32, #tpu.memory_space<vmem>>, vector<16x128xf32>,
    %44 = vector.extract_strided_slice %41 {offsets = [18, 0], sizes = [16, 128], strides = [1, 1]} : vector<34x128xf32> to vector<16x128xf32>
    %c19_44 = arith.constant 19 : index
    %c0_45 = arith.constant 0 : index
    %45 = vector.load %arg10[%c19_44, %c0_45] : memref<36x128xf32, #tpu.memory_space<vmem>>, vector<16x128xf32>
    tpu.vector_store %arg10[%c19_44, %c0_45], %44 {strides = array<i32>} : memref<36x128xf32, #tpu.memory_space<vmem>>, vector<16x128xf32>,
    %c0_46 = arith.constant 0 : index
    %c0_47 = arith.constant 0 : index
    %c0_48 = arith.constant 0 : index
    %46 = vector.load %arg4[%c0_46, %c0_47, %c0_48] : memref<3x128x128xbf16, #tpu.memory_space<vmem>>, vector<1x128x128xbf16>
    %47 = vector.shape_cast %46 : vector<1x128x128xbf16> to vector<128x128xbf16>
    %c0_49 = arith.constant 0 : index
    %c0_50 = arith.constant 0 : index
    %48 = vector.load %arg10[%c0_49, %c0_50] : memref<36x128xf32, #tpu.memory_space<vmem>>, vector<34x128xf32>
    %49 = arith.truncf %48 : vector<34x128xf32> to vector<34x128xbf16>
    %cst_51 = arith.constant dense<0.000000e+00> : vector<34x128xf32>
    %50 = tpu.matmul %49, %47, %cst_51 {dimension_numbers = #tpu.dot_dimension_numbers<[1], [0], [0], [1], [0, 0, 1, 1], [], []>} : vector<34x128xbf16>, vector<128x128xbf16>, vector<34x128xf32> -> vector<34x128xf32>
    %c1_52 = arith.constant 1 : index
    %c0_53 = arith.constant 0 : index
    %c0_54 = arith.constant 0 : index
    %51 = vector.load %arg4[%c1_52, %c0_53, %c0_54] : memref<3x128x128xbf16, #tpu.memory_space<vmem>>, vector<1x128x128xbf16>
    %52 = vector.shape_cast %51 : vector<1x128x128xbf16> to vector<128x128xbf16>
    %c1_55 = arith.constant 1 : index
    %c0_56 = arith.constant 0 : index
    %53 = vector.load %arg10[%c1_55, %c0_56] : memref<36x128xf32, #tpu.memory_space<vmem>>, vector<34x128xf32>
    %54 = arith.truncf %53 : vector<34x128xf32> to vector<34x128xbf16>
    %cst_57 = arith.constant dense<0.000000e+00> : vector<34x128xf32>
    %55 = tpu.matmul %54, %52, %cst_57 {dimension_numbers = #tpu.dot_dimension_numbers<[1], [0], [0], [1], [0, 0, 1, 1], [], []>} : vector<34x128xbf16>, vector<128x128xbf16>, vector<34x128xf32> -> vector<34x128xf32>
    %56 = arith.addf %50, %55 : vector<34x128xf32>
    %c2_58 = arith.constant 2 : index
    %c0_59 = arith.constant 0 : index
    %c0_60 = arith.constant 0 : index
    %57 = vector.load %arg4[%c2_58, %c0_59, %c0_60] : memref<3x128x128xbf16, #tpu.memory_space<vmem>>, vector<1x128x128xbf16>
    %58 = vector.shape_cast %57 : vector<1x128x128xbf16> to vector<128x128xbf16>
    %c2_61 = arith.constant 2 : index
    %c0_62 = arith.constant 0 : index
    %59 = vector.load %arg10[%c2_61, %c0_62] : memref<36x128xf32, #tpu.memory_space<vmem>>, vector<34x128xf32>
    %60 = arith.truncf %59 : vector<34x128xf32> to vector<34x128xbf16>
    %cst_63 = arith.constant dense<0.000000e+00> : vector<34x128xf32>
    %61 = tpu.matmul %60, %58, %cst_63 {dimension_numbers = #tpu.dot_dimension_numbers<[1], [0], [0], [1], [0, 0, 1, 1], [], []>} : vector<34x128xbf16>, vector<128x128xbf16>, vector<34x128xf32> -> vector<34x128xf32>
    %62 = arith.addf %56, %61 : vector<34x128xf32>
    %c0_64 = arith.constant 0 : index
    %c0_65 = arith.constant 0 : index
    %63 = vector.load %arg6[%c0_64, %c0_65] : memref<1x128xf32, #tpu.memory_space<vmem>>, vector<1x128xf32>
    %64 = vector.broadcast %63 : vector<1x128xf32> to vector<34x128xf32>
    %65 = arith.addf %62, %64 : vector<34x128xf32>
    %cst_66 = arith.constant 0.000000e+00 : f32
    %66 = vector.broadcast %cst_66 : f32 to vector<34x128xf32>
    %67 = arith.maximumf %65, %66 : vector<34x128xf32>
    %68 = arith.addf %67, %24 : vector<34x128xf32>
    %cst_67 = arith.constant 0.000000e+00 : f32
    %69 = vector.broadcast %cst_67 : f32 to vector<34x128xf32>
    %70 = arith.maximumf %68, %69 : vector<34x128xf32>
    %71 = vector.extract_strided_slice %70 {offsets = [0, 0], sizes = [16, 128], strides = [1, 1]} : vector<34x128xf32> to vector<16x128xf32>
    %c0_68 = arith.constant 0 : index
    %c0_69 = arith.constant 0 : index
    %c0_70 = arith.constant 0 : index
    %72 = vector.load %arg8[%c0_68, %c0_69, %c0_70] : memref<2x16x128xf32, #tpu.memory_space<vmem>>, vector<1x16x128xf32>
    %73 = vector.shape_cast %72 : vector<1x16x128xf32> to vector<16x128xf32>
    %74 = vector.shape_cast %71 : vector<16x128xf32> to vector<1x16x128xf32>
    tpu.vector_store %arg8[%c0_68, %c0_69, %c0_70], %74 {strides = array<i32>} : memref<2x16x128xf32, #tpu.memory_space<vmem>>, vector<1x16x128xf32>,
    %75 = vector.extract_strided_slice %70 {offsets = [18, 0], sizes = [16, 128], strides = [1, 1]} : vector<34x128xf32> to vector<16x128xf32>
    %c1_71 = arith.constant 1 : index
    %c0_72 = arith.constant 0 : index
    %c0_73 = arith.constant 0 : index
    %76 = vector.load %arg8[%c1_71, %c0_72, %c0_73] : memref<2x16x128xf32, #tpu.memory_space<vmem>>, vector<1x16x128xf32>
    %77 = vector.shape_cast %76 : vector<1x16x128xf32> to vector<16x128xf32>
    %78 = vector.shape_cast %75 : vector<16x128xf32> to vector<1x16x128xf32>
    tpu.vector_store %arg8[%c1_71, %c0_72, %c0_73], %78 {strides = array<i32>} : memref<2x16x128xf32, #tpu.memory_space<vmem>>, vector<1x16x128xf32>,
    return
  }
  func.func @transform_0(%arg0: i32) -> (i32, i32, i32) {
    %c0_i32 = arith.constant 0 : i32
    %c0_i32_0 = arith.constant 0 : i32
    %c0_i32_1 = arith.constant 0 : i32
    return %arg0, %c0_i32, %c0_i32_0 : i32, i32, i32
  }
  func.func @transform_1(%arg0: i32) -> (i32, i32, i32) {
    %c0_i32 = arith.constant 0 : i32
    %c0_i32_0 = arith.constant 0 : i32
    %c0_i32_1 = arith.constant 0 : i32
    %c0_i32_2 = arith.constant 0 : i32
    return %c0_i32, %c0_i32_0, %c0_i32_1 : i32, i32, i32
  }
  func.func @transform_2(%arg0: i32) -> (i32, i32) {
    %c0_i32 = arith.constant 0 : i32
    %c0_i32_0 = arith.constant 0 : i32
    %c0_i32_1 = arith.constant 0 : i32
    return %c0_i32, %c0_i32_0 : i32, i32
  }
  func.func @transform_3(%arg0: i32) -> (i32, i32, i32) {
    %c0_i32 = arith.constant 0 : i32
    %c0_i32_0 = arith.constant 0 : i32
    %c0_i32_1 = arith.constant 0 : i32
    %c0_i32_2 = arith.constant 0 : i32
    return %c0_i32, %c0_i32_0, %c0_i32_1 : i32, i32, i32
  }
  func.func @transform_4(%arg0: i32) -> (i32, i32) {
    %c0_i32 = arith.constant 0 : i32
    %c0_i32_0 = arith.constant 0 : i32
    %c0_i32_1 = arith.constant 0 : i32
    return %c0_i32, %c0_i32_0 : i32, i32
  }
  func.func @transform_5(%arg0: i32) -> (i32, i32) {
    %c0_i32 = arith.constant 0 : i32
    %c0_i32_0 = arith.constant 0 : i32
    %c0_i32_1 = arith.constant 0 : i32
    return %c0_i32, %c0_i32_0 : i32, i32
  }
  func.func @transform_6(%arg0: i32) -> (i32, i32) {
    %c0_i32 = arith.constant 0 : i32
    %c0_i32_0 = arith.constant 0 : i32
    %c0_i32_1 = arith.constant 0 : i32
    return %c0_i32, %c0_i32_0 : i32, i32
  }
  func.func @transform_7(%arg0: i32) -> (i32, i32, i32) {
    %c0_i32 = arith.constant 0 : i32
    %c0_i32_0 = arith.constant 0 : i32
    %c0_i32_1 = arith.constant 0 : i32
    return %arg0, %c0_i32, %c0_i32_0 : i32, i32, i32
  }
}

</mosaic_0001>

<bundles_post_ra>
// kernel: residual_block_apply_nhwc.1
= control target key start
LH: loop header
LB: loop body
LE: loop exit
PB: predicated region body
PF: predicated region fallthrough
CT: control target
= control target key end

     0   :  { %v1170_v1 = vmov 0.0   ;;  %v1171_v2 = vmov 0   ;;  %vm27_vm0 = vcmask 516096   ;;  %vm1172_vm1 = vmmov 0   ;;  %s1470_s2 = inlined_call_operand.vmem [shape: bf16[64,256], index: 2, kind: input, shape index: {}]   ;;  %s1471_s1 = inlined_call_operand.vmem [shape: bf16[2,64,128], index: 1, kind: input, shape index: {}]   ;;  %s1472_s0 = inlined_call_operand.vmem [shape: f32[2,16,64], index: 0, kind: input, shape index: {}]   ;;  %s1473_s3 = inlined_call_operand.vmem [shape: bf16[3,128,128], index: 3, kind: input, shape index: {}]   ;;  %s1474_s4 = inlined_call_operand.vmem [shape: f32[1,128], index: 4, kind: input, shape index: {}]   ;;  %s1475_s5 = inlined_call_operand.vmem [shape: f32[1,128], index: 5, kind: input, shape index: {}]   ;;  %s1476_s6 = inlined_call_operand.vmem [shape: f32[1,128], index: 6, kind: input, shape index: {}]   ;;  %s1477_s7 = inlined_call_operand.vmem [shape: f32[2,16,128], index: 7, kind: output, shape index: {}]  }
   0x1   :  { %v1126_v0 = vld [vmem:[%s1470_s2 + $0x4] ss:$8 sps:$4 sm:$0xff]   ;;  %999 = vmatprep.subr.bf16.mxu1 %v1170_v1  ;;  %30 = vst [vmem:[#allocation3] sm:$0x1] %v1170_v1  ;;  %31 = vst [vmem:[#allocation3 + $0x11] sm:$0x1] %v1170_v1  ;;  %143 = vmatprep.mubr.bf16.mxu0 %v1171_v2 }
   0x2   :  { %39 = vst [vmem:[#allocation3 + $0x12] sm:$0x1] %v1170_v1  ;;  %40 = vst [vmem:[#allocation3 + $0x23] sm:$0x1] %v1170_v1  ;;  %v1128_v3 = vld [vmem:[%s1470_s2] ss:$8 sps:$4 sm:$0xff]   ;;  %1007 = vmatprep.mubr.msk.bf16.mxu1 %vm1172_vm1, %v1170_v1  ;;  %111 = vmatprep.subr.bf16.mxu0 %v1126_v0 }
   0x3   :  { %28 = vst.msk [vmem:[#allocation2] sm:$0x1] %vm27_vm0, %v1170_v1  ;;  %29 = vst.msk [vmem:[#allocation2 + $0x11] sm:$0x1] %vm27_vm0, %v1170_v1  ;;  %v1129_v4 = vld [vmem:[%s1471_s1] sm:$0xff]   ;;  %112 = vmatpush1.bf16.msra.mxu0 %v1128_v3  ;;  %v1133_v7 = vld [vmem:[%s1471_s1 + $0x8] sm:$0xff]  }
   0x4   :  { %37 = vst.msk [vmem:[#allocation2 + $0x12] sm:$0x1] %vm27_vm0, %v1170_v1  ;;  %38 = vst.msk [vmem:[#allocation2 + $0x23] sm:$0x1] %vm27_vm0, %v1170_v1  ;;  %v1130_v5 = vld [vmem:[%s1470_s2 + $0x14] ss:$8 sps:$4 sm:$0xff]   ;;  %1000 = vmatpush3.bf16.msra.mxu1 %v1129_v4 }
   0x5   :  { %v1132_v6 = vld [vmem:[%s1470_s2 + $0x10] ss:$8 sps:$4 sm:$0xff]   ;;  %113 = vmatprep.subr.bf16.mxu0 %v1130_v5  ;;  %1001 = vmatprep.subr.bf16.mxu1 %v1170_v1  ;;  %v1134_v8 = vld [vmem:[%s1470_s2 + $0x24] ss:$8 sps:$4 sm:$0xff]   ;;  %v1136_v9 = vld [vmem:[%s1470_s2 + $0x20] ss:$8 sps:$4 sm:$0xff]  }
   0x6   :  { %v1137_v10 = vld [vmem:[%s1471_s1 + $0x10] sm:$0xff]   ;;  %vm34_vm2 = vcmask 523264   ;;  %v32_v12 = vld [vmem:[%s1472_s0] sm:$0xff]  ;;  %v33_v13 = vld [vmem:[%s1472_s0 + $0x8] sm:$0xff] }
   0x7   :  { %114 = vmatpush1.bf16.msra.mxu0 %v1132_v6  ;;  %v1138_v11 = vld [vmem:[%s1470_s2 + $0x34] ss:$8 sps:$4 sm:$0xff]   ;;  %v1140_v14 = vld [vmem:[%s1470_s2 + $0x30] ss:$8 sps:$4 sm:$0xff]   ;;  %35 = vst.msk [vmem:[#allocation2 + $0x1] sm:$0xff] %vm34_vm2, %v32_v12  ;;  %36 = vst.msk [vmem:[#allocation2 + $0x9] sm:$0xff] %vm34_vm2, %v33_v13 }
   0x8   :  { %1002 = vmatpush3.bf16.msra.mxu1 %v1133_v7  ;;  %115 = vmatprep.subr.bf16.mxu0 %v1134_v8  ;;  %v1141_v15 = vld [vmem:[%s1471_s1 + $0x18] sm:$0xff]   ;;  %v855_v16 = vld [vmem:[%s1472_s0 + $0x10] sm:$0xff]  ;;  %v1142_v18 = vld [vmem:[%s1471_s1 + $0x20] sm:$0xff]  }
   0x9   :  { %1003 = vmatprep.subr.bf16.mxu1 %v1170_v1  ;;  %v856_v17 = vld [vmem:[%s1472_s0 + $0x18] sm:$0xff]  ;;  %44 = vst.msk [vmem:[#allocation2 + $0x13] sm:$0xff] %vm34_vm2, %v855_v16  ;;  %v1143_v25 = vld [vmem:[%s1471_s1 + $0x28] sm:$0xff]   ;;  %v1144_v32 = vld [vmem:[%s1471_s1 + $0x30] sm:$0xff]  }
   0xa   :  { %45 = vst.msk [vmem:[#allocation2 + $0x1b] sm:$0xff] %vm34_vm2, %v856_v17  ;;  %v1145_v34 = vld [vmem:[%s1471_s1 + $0x38] sm:$0xff]   ;;  %v1146_v46 = vld [vmem:[%s1473_s3 + $0x40] sm:$0xff]   ;;  %v1148_v47 = vld [vmem:[%s1473_s3 + $0x48] sm:$0xff]  }
   0xb   :  { %116 = vmatpush1.bf16.msra.mxu0 %v1136_v9  ;;  %v1150_v48 = vld [vmem:[%s1473_s3 + $0x50] sm:$0xff]   ;;  %v1147_v49 = vld [vmem:[%s1473_s3] sm:$0xff]   ;;  %v1152_v50 = vld [vmem:[%s1473_s3 + $0x58] sm:$0xff]  }
   0xc   :  { %1004 = vmatpush3.bf16.msra.mxu1 %v1137_v10  ;;  %117 = vmatprep.subr.bf16.mxu0 %v1138_v11  ;;  %v1149_v51 = vld [vmem:[%s1473_s3 + $0x8] sm:$0xff]   ;;  %v1154_v52 = vld [vmem:[%s1473_s3 + $0x60] sm:$0xff]   ;;  %v1151_v53 = vld [vmem:[%s1473_s3 + $0x10] sm:$0xff]  }
   0xd   :  { %1005 = vmatprep.subr.bf16.mxu1 %v1170_v1  ;;  %v1156_v54 = vld [vmem:[%s1473_s3 + $0x68] sm:$0xff]   ;;  %v1153_v55 = vld [vmem:[%s1473_s3 + $0x18] sm:$0xff]   ;;  %v1158_v56 = vld [vmem:[%s1473_s3 + $0x70] sm:$0xff]  }
   0xe   :  { %v54_v19 = vld [vmem:[#allocation2 + $0x1] sm:$0xff]  ;;  %v55_v20 = vld [vmem:[#allocation2 + $0x9] sm:$0xff]  ;;  %v1160_v58 = vld [vmem:[%s1473_s3 + $0x78] sm:$0xff]  }
   0xf   :  { %118 = vmatpush1.bf16.msra.mxu0 %v1140_v14  ;;  %v192_v21 = vld [vmem:[#allocation2] sm:$0xff]  ;;  %v59_v22 = vpack.c.bf16 %v55_v20, %v54_v19  ;;  %v193_v23 = vld [vmem:[#allocation2 + $0x8] sm:$0xff]  ;;  %v1159_v60 = vld [vmem:[%s1473_s3 + $0x30] sm:$0xff]  }
  0x10   :  { %1006 = vmatpush3.bf16.msra.mxu1 %v1141_v15  ;;  %1019 = vmatprep.subr.bf16.mxu0 %v1170_v1  ;;  %v197_v24 = vpack.c.bf16 %v193_v23, %v192_v21  ;;  %v56_v26 = vld [vmem:[#allocation2 + $0x11] sm:$0xff]  ;;  %v303_v38 = vld [vmem:[#allocation2 + $0x2] sm:$0xff] }
  0x11   :  { %1039 = vmatprep.subr.bf16.mxu1 %v1170_v1  ;;  %v57_v27 = vld [vmem:[#allocation2 + $0x19] sm:$0xff]  ;;  %v194_v28 = vld [vmem:[#allocation2 + $0x10] sm:$0xff]  ;;  %v58_v33 = vld [vmem:[#allocation2 + $0x21] sm:$0x3] }
  0x12   :  { %865 = vmatmul.mubr.msk.bf16.vlgmr.msra.gmra.mrb[0].mxu0 %vm34_vm2, %v59_v22  ;;  %v195_v29 = vld [vmem:[#allocation2 + $0x18] sm:$0xff]  ;;  %v60_v30 = vpack.c.bf16 %v57_v27, %v56_v26  ;;  %v196_v35 = vld [vmem:[#allocation2 + $0x20] sm:$0x3]  ;;  %v61_v36 = vpack.c.bf16 %v58_v33, %v58_v33  ;;  %v304_v39 = vld [vmem:[#allocation2 + $0xa] sm:$0xff] }
  0x13   :  { %1008 = vmatmul.mubr.msk.bf16.vlgmr.msra.gmra.mrb[0].mxu1 %vm34_vm2, %v197_v24  ;;  %1020 = vmatpush3.bf16.msra.mxu0 %v1142_v18  ;;  %v198_v31 = vpack.c.bf16 %v195_v29, %v194_v28  ;;  %v199_v37 = vpack.c.bf16 %v196_v35, %v196_v35  ;;  %v308_v40 = vpack.c.bf16 %v304_v39, %v303_v38  ;;  %v305_v41 = vld [vmem:[#allocation2 + $0x12] sm:$0xff]  ;;  %v306_v42 = vld [vmem:[#allocation2 + $0x1a] sm:$0xff]  ;;  %v307_v44 = vld [vmem:[#allocation2 + $0x22] sm:$0x3] }
  0x14   :  { %1021 = vmatprep.subr.bf16.mxu0 %v1170_v1  ;;  %153 = vmatprep.mubr.bf16.mxu0 %v1171_v2  ;;  %v309_v43 = vpack.c.bf16 %v306_v42, %v305_v41  ;;  %v310_v45 = vpack.c.bf16 %v307_v44, %v307_v44  ;;  %v1155_v57 = vld [vmem:[%s1473_s3 + $0x20] sm:$0xff]   ;;  %v1157_v59 = vld [vmem:[%s1473_s3 + $0x28] sm:$0xff]   ;;  %v1161_v61 = vld [vmem:[%s1473_s3 + $0x38] sm:$0xff]  }
  0x15   :  { %1011 = vmatprep.mubr.msk.bf16.mxu1 %vm1172_vm1, %v1170_v1  ;;  %1040 = vmatpush3.bf16.msra.mxu1 %v1146_v46  ;;  %v891_v29 = vld [vmem:[%s1474_s4] ss:$0 sm:$0xff] }
  0x16   :  { %1041 = vmatprep.subr.bf16.mxu1 %v1170_v1 }
  0x17   :  { %1022 = vmatpush3.bf16.msra.mxu0 %v1143_v25 }
  0x18   :  { %1023 = vmatprep.subr.bf16.mxu0 %v1170_v1 }
  0x19   :  { %1042 = vmatpush3.bf16.msra.mxu1 %v1148_v47 }
  0x1a   :  { %866 = vmatmul.mubr.msk.bf16.gmra.mrb[4].mxu0 %vm34_vm2, %v60_v30  ;;  %1043 = vmatprep.subr.bf16.mxu1 %v1170_v1 }
  0x1b   :  { %1012 = vmatmul.mubr.msk.bf16.gmra.mrb[4].mxu1 %vm34_vm2, %v198_v31  ;;  %1024 = vmatpush3.bf16.msra.mxu0 %v1144_v32 }
  0x1c   :  { %163 = vmatprep.mubr.bf16.mxu0 %v1171_v2  ;;  %1015 = vmatprep.mubr.msk.bf16.mxu1 %vm1172_vm1, %v1170_v1 }
  0x1d   :  { %1025 = vmatprep.subr.bf16.mxu0 %v1170_v1  ;;  %1044 = vmatpush3.bf16.msra.mxu1 %v1150_v48  ;;  %v1163_v48 = vld [vmem:[%s1473_s3 + $0x88] sm:$0xff]  }
  0x1e   :  { %1045 = vmatprep.subr.bf16.mxu1 %v1170_v1 }
  0x1f   :  { %1026 = vmatpush3.bf16.msra.mxu0 %v1145_v34 }
  0x20   :  { %1067 = vmatprep.subr.bf16.mxu0 %v1170_v1 }
  0x21   :  { %1046 = vmatpush3.bf16.msra.mxu1 %v1152_v50 }
  0x22   :  { %867 = vmatmul.mubr.msk.bf16.gmra.mrb[8].mxu0 %vm34_vm2, %v61_v36  ;;  %1047 = vmatprep.subr.bf16.mxu1 %v1170_v1 }
  0x23   :  { %1016 = vmatmul.mubr.msk.bf16.gmra.mrb[8].mxu1 %vm34_vm2, %v199_v37  ;;  %1027 = vmatprep.mubr.msk.bf16.mxu0 %vm1172_vm1, %v1170_v1 }
  0x24   :  { %1055 = vmatprep.mubr.msk.bf16.mxu1 %vm1172_vm1, %v1170_v1 }
  0x25   :  { %1048 = vmatpush3.bf16.msra.mxu1 %v1154_v52 }
  0x26   :  { %1049 = vmatprep.subr.bf16.mxu1 %v1170_v1 }
  0x29   :  { %1050 = vmatpush3.bf16.msra.mxu1 %v1156_v54 }
  0x2a   :  { %1028 = vmatmul.mubr.msk.bf16.vlgmr.msra.gmra.mrb[12].mxu0 %vm34_vm2, %v308_v40  ;;  %1051 = vmatprep.subr.bf16.mxu1 %v1170_v1  ;;  %v1162_v40 = vld [vmem:[%s1473_s3 + $0x80] sm:$0xff]  }
  0x2b   :  { %1031 = vmatprep.mubr.msk.bf16.mxu0 %vm1172_vm1, %v1170_v1  ;;  %1068 = vmatpush3.bf16.msra.mxu0 %v1147_v49 }
  0x2c   :  { %1069 = vmatprep.subr.bf16.mxu0 %v1170_v1 }
  0x2d   :  { %1052 = vmatpush3.bf16.msra.mxu1 %v1158_v56 }
  0x2e   :  { %1053 = vmatprep.subr.bf16.mxu1 %v1170_v1 }
  0x2f   :  { %1070 = vmatpush3.bf16.msra.mxu0 %v1149_v51 }
  0x30   :  { %1071 = vmatprep.subr.bf16.mxu0 %v1170_v1 }
  0x31   :  { %1054 = vmatpush3.bf16.msra.mxu1 %v1160_v58 }
  0x32   :  { %1032 = vmatmul.mubr.msk.bf16.gmra.mrb[16].mxu0 %vm34_vm2, %v309_v43  ;;  %1095 = vmatprep.subr.bf16.mxu1 %v1170_v1 }
  0x33   :  { %1035 = vmatprep.mubr.msk.bf16.mxu0 %vm1172_vm1, %v1170_v1  ;;  %1072 = vmatpush3.bf16.msra.mxu0 %v1151_v53 }
  0x34   :  { %1073 = vmatprep.subr.bf16.mxu0 %v1170_v1 }
  0x37   :  { %1074 = vmatpush3.bf16.msra.mxu0 %v1153_v55  ;;  %v1164_v55 = vld [vmem:[%s1473_s3 + $0x90] sm:$0xff]  }
  0x38   :  { %1075 = vmatprep.subr.bf16.mxu0 %v1170_v1 }
  0x3a   :  { %1036 = vmatmul.mubr.msk.bf16.gmra.mrb[20].mxu0 %vm34_vm2, %v310_v45 }
  0x3b   :  { %1083 = vmatprep.mubr.msk.bf16.mxu0 %vm1172_vm1, %v1170_v1  ;;  %1076 = vmatpush3.bf16.msra.mxu0 %v1155_v57 }
  0x3c   :  { %1077 = vmatprep.subr.bf16.mxu0 %v1170_v1 }
  0x3f   :  { %1078 = vmatpush3.bf16.msra.mxu0 %v1157_v59 }
  0x40   :  { %1079 = vmatprep.subr.bf16.mxu0 %v1170_v1 }
  0x43   :  { %1080 = vmatpush3.bf16.msra.mxu0 %v1159_v60 }
  0x44   :  { %1081 = vmatprep.subr.bf16.mxu0 %v1170_v1 }
  0x47   :  { %1082 = vmatpush3.bf16.msra.mxu0 %v1161_v61 }
  0xe5   :  { %v145_v62 = vpop.f32.mrb[0].mxu0 }
  0xe6   :  { %v267_v63 = vpop.f32.mrb[0].mxu1  ;;  %v1386_v0 = vpop.f32.mrb[1].mxu0 }
  0xe7   :  { %v289_v2 = vadd.f32 %v267_v63, %v145_v62  ;;  %v1009_v3 = vpop.f32.mrb[1].mxu1  ;;  %v149_v4 = vpop.f32.mrb[2].mxu0  ;;  %v1165_v62 = vld [vmem:[%s1473_s3 + $0x98] sm:$0xff]  }
  0xe8   :  { %v270_v5 = vpop.f32.mrb[2].mxu1  ;;  %v1388_v6 = vpop.f32.mrb[3].mxu0 }
  0xe9   :  { %v290_v7 = vadd.f32 %v270_v5, %v149_v4  ;;  %v1010_v8 = vpop.f32.mrb[3].mxu1 }
  0xed   :  { %v155_v9 = vpop.f32.mrb[4].mxu0 }
  0xee   :  { %v275_v10 = vpop.f32.mrb[4].mxu1  ;;  %v1390_v11 = vpop.f32.mrb[5].mxu0 }
  0xef   :  { %v291_v12 = vadd.f32 %v275_v10, %v155_v9  ;;  %v1013_v13 = vpop.f32.mrb[5].mxu1  ;;  %v159_v14 = vpop.f32.mrb[6].mxu0  ;;  %v1167_v9 = vld [vmem:[%s1473_s3 + $0xa8] sm:$0xff]  }
  0xf0   :  { %v278_v15 = vpop.f32.mrb[6].mxu1  ;;  %v1392_v16 = vpop.f32.mrb[7].mxu0 }
  0xf1   :  { %v292_v17 = vadd.f32 %v278_v15, %v159_v14  ;;  %v1014_v18 = vpop.f32.mrb[7].mxu1  ;;  %v1168_v14 = vld [vmem:[%s1473_s3 + $0xb0] sm:$0xff]  }
  0xf5   :  { %v165_v19 = vpop.f32.mrb[8].mxu0 }
  0xf6   :  { %v1394_v20 = vpop.f32.mrb[9].mxu0  ;;  %v283_v21 = vpop.f32.mrb[8].mxu1 }
  0xf7   :  { %v293_v22 = vadd.f32 %v283_v21, %v165_v19  ;;  %v169_v23 = vpop.f32.mrb[10].mxu0  ;;  %v1017_v24 = vpop.f32.mrb[9].mxu1 }
  0xf8   :  { %v170_v25 = vpop.f32.mrb[11].mxu0  ;;  %v286_v26 = vpop.f32.mrb[10].mxu1 }
  0xf9   :  { %v1018_v27 = vpop.f32.mrb[11].mxu1 }
  0xfd   :  { %v378_v28 = vpop.f32.mrb[12].mxu0 }
  0xfe   :  { %v400_v30 = vadd.f32 %v378_v28, %v289_v2  ;;  %v1029_v31 = vpop.f32.mrb[13].mxu0 }
  0xff   :  { %v381_v32 = vpop.f32.mrb[14].mxu0 }
 0x100   :  { %v412_v33 = vadd.f32 %v891_v29, %v400_v30  ;;  %v401_v34 = vadd.f32 %v381_v32, %v290_v7  ;;  %v1030_v35 = vpop.f32.mrb[15].mxu0  ;;  %v1166_v7 = vld [vmem:[%s1473_s3 + $0xa0] sm:$0xff]  }
 0x102   :  { %v417_v36 = vmax.f32 %v412_v33, 0.0  ;;  %v413_v37 = vadd.f32 %v891_v29, %v401_v34 }
 0x104   :  { %422 = vst [vmem:[#allocation3 + $0x1] sm:$0xff] %v417_v36  ;;  %v418_v38 = vmax.f32 %v413_v37, 0.0 }
 0x105   :  { %v386_v39 = vpop.f32.mrb[16].mxu0 }
 0x106   :  { %423 = vst [vmem:[#allocation3 + $0x9] sm:$0xff] %v418_v38  ;;  %v402_v41 = vadd.f32 %v386_v39, %v291_v12  ;;  %v1033_v42 = vpop.f32.mrb[17].mxu0  ;;  %v473_v43 = vpack.c.bf16 %v418_v38, %v417_v36 }
 0x107   :  { %v389_v44 = vpop.f32.mrb[18].mxu0 }
 0x108   :  { %v414_v45 = vadd.f32 %v891_v29, %v402_v41  ;;  %v403_v46 = vadd.f32 %v389_v44, %v292_v17  ;;  %v1034_v47 = vpop.f32.mrb[19].mxu0  ;;  %1056 = vmatmul.mubr.bf16.vlgmr.msra.gmra.mrb[12].mxu1 %v473_v43  ;;  %v1169_v17 = vld [vmem:[%s1473_s3 + $0xb8] sm:$0xff]  }
 0x109   :  { %1096 = vmatpush3.bf16.msra.mxu1 %v1162_v40  ;;  %1059 = vmatprep.mubr.msk.bf16.mxu1 %vm1172_vm1, %v1170_v1 }
 0x10a   :  { %v419_v49 = vmax.f32 %v414_v45, 0.0  ;;  %v415_v50 = vadd.f32 %v891_v29, %v403_v46  ;;  %1097 = vmatprep.subr.bf16.mxu1 %v1170_v1 }
 0x10b   :  { %v443_v53 = vld [vmem:[#allocation3] sm:$0xff] }
 0x10c   :  { %424 = vst [vmem:[#allocation3 + $0x11] sm:$0xfc] %v419_v49  ;;  %v420_v51 = vmax.f32 %v415_v50, 0.0 }
 0x10d   :  { %v394_v52 = vpop.f32.mrb[20].mxu0  ;;  %v444_v54 = vld [vmem:[#allocation3 + $0x8] sm:$0xff]  ;;  %1098 = vmatpush3.bf16.msra.mxu1 %v1163_v48 }
 0x10e   :  { %425 = vst [vmem:[#allocation3 + $0x19] sm:$0xff] %v420_v51  ;;  %v404_v56 = vadd.f32 %v394_v52, %v293_v22  ;;  %v448_v57 = vpack.c.bf16 %v444_v54, %v443_v53  ;;  %v1037_v58 = vpop.f32.mrb[21].mxu0  ;;  %1099 = vmatprep.subr.bf16.mxu1 %v1170_v1  ;;  %v701_v18 = vld [vmem:[#allocation3 + $0x2] sm:$0xff]  ;;  %v702_v19 = vld [vmem:[#allocation3 + $0xa] sm:$0xff] }
 0x10f   :  { %v397_v59 = vpop.f32.mrb[22].mxu0  ;;  %v706_v21 = vpack.c.bf16 %v702_v19, %v701_v18 }
 0x110   :  { %v416_v60 = vadd.f32 %v891_v29, %v404_v56  ;;  %1084 = vmatmul.mubr.bf16.vlgmr.msra.gmra.mrb[24].mxu0 %v448_v57  ;;  %v1038_v61 = vpop.f32.mrb[23].mxu0  ;;  %v948_v56 = vld [vmem:[%s1475_s5] ss:$0 sm:$0xff] }
 0x111   :  { %1087 = vmatprep.mubr.msk.bf16.mxu0 %vm1172_vm1, %v1170_v1  ;;  %1100 = vmatpush3.bf16.msra.mxu1 %v1164_v55  ;;  %v868_v59 = vld [vmem:[%s1476_s6] ss:$0 sm:$0xff] }
 0x112   :  { %v421_v63 = vmax.f32 %v416_v60, 0.0  ;;  %1101 = vmatprep.subr.bf16.mxu1 %v1170_v1 }
 0x113   :  { %v470_v2 = vld [vmem:[#allocation3 + $0x11] sm:$0xff] }
 0x114   :  { %426 = vst [vmem:[#allocation3 + $0x21] sm:$0x3] %v421_v63  ;;  %v474_v3 = vpack.c.bf16 %v420_v51, %v470_v2  ;;  %v445_v4 = vld [vmem:[#allocation3 + $0x10] sm:$0xff]  ;;  %v179_v2 = vadd.f32 %v868_v59, %v1386_v0 }
 0x115   :  { %v446_v5 = vld [vmem:[#allocation3 + $0x18] sm:$0xff]  ;;  %1102 = vmatpush3.bf16.msra.mxu1 %v1165_v62 }
 0x116   :  { %1060 = vmatmul.mubr.bf16.gmra.mrb[16].mxu1 %v474_v3  ;;  %v449_v8 = vpack.c.bf16 %v446_v5, %v445_v4  ;;  %1103 = vmatprep.subr.bf16.mxu1 %v1170_v1  ;;  %v703_v23 = vld [vmem:[#allocation3 + $0x12] sm:$0xff]  ;;  %v180_v5 = vadd.f32 %v868_v59, %v1388_v6 }
 0x117   :  { %1063 = vmatprep.mubr.msk.bf16.mxu1 %vm1172_vm1, %v1170_v1 }
 0x118   :  { %1088 = vmatmul.mubr.bf16.gmra.mrb[28].mxu0 %v449_v8 }
 0x119   :  { %1091 = vmatprep.mubr.msk.bf16.mxu0 %vm1172_vm1, %v1170_v1  ;;  %1104 = vmatpush3.bf16.msra.mxu1 %v1166_v7 }
 0x11a   :  { %1105 = vmatprep.subr.bf16.mxu1 %v1170_v1 }
 0x11b   :  { %v472_v10 = vld [vmem:[#allocation3 + $0x21] sm:$0x3] }
 0x11c   :  { %v447_v12 = vld [vmem:[#allocation3 + $0x20] sm:$0x3]  ;;  %v475_v13 = vpack.c.bf16 %v472_v10, %v472_v10  ;;  %v705_v25 = vld [vmem:[#allocation3 + $0x22] sm:$0x3] }
 0x11d   :  { %1106 = vmatpush3.bf16.msra.mxu1 %v1167_v9  ;;  %v450_v15 = vpack.c.bf16 %v447_v12, %v447_v12  ;;  %v704_v22 = vld [vmem:[#allocation3 + $0x1a] sm:$0xff]  ;;  %v708_v26 = vpack.c.bf16 %v705_v25, %v705_v25 }
 0x11e   :  { %1064 = vmatmul.mubr.bf16.gmra.mrb[20].mxu1 %v475_v13  ;;  %1107 = vmatprep.subr.bf16.mxu1 %v1170_v1  ;;  %v707_v24 = vpack.c.bf16 %v704_v22, %v703_v23  ;;  %v182_v23 = vadd.f32 %v868_v59, %v1392_v16 }
 0x11f   :  { %1111 = vmatprep.mubr.msk.bf16.mxu1 %vm1172_vm1, %v1170_v1 }
 0x120   :  { %1092 = vmatmul.mubr.bf16.gmra.mrb[32].mxu0 %v450_v15 }
 0x121   :  { %1108 = vmatpush3.bf16.msra.mxu1 %v1168_v14 }
 0x122   :  { %1109 = vmatprep.subr.bf16.mxu1 %v1170_v1 }
 0x125   :  { %1110 = vmatpush3.bf16.msra.mxu1 %v1169_v17 }
 0x128   :  { %1112 = vmatmul.mubr.bf16.vlgmr.msra.gmra.mrb[24].mxu1 %v706_v21  ;;  %v181_v21 = vadd.f32 %v868_v59, %v1390_v11 }
 0x129   :  { %1115 = vmatprep.mubr.msk.bf16.mxu1 %vm1172_vm1, %v1170_v1 }
 0x130   :  { %1116 = vmatmul.mubr.bf16.gmra.mrb[28].mxu1 %v707_v24 }
 0x131   :  { %1119 = vmatprep.mubr.msk.bf16.mxu1 %vm1172_vm1, %v1170_v1 }
 0x138   :  { %1120 = vmatmul.mubr.bf16.gmra.mrb[32].mxu1 %v708_v26 }
 0x1db   :  { %v558_v27 = vpop.f32.mrb[12].mxu1 }
 0x1dc   :  { %v1057_v28 = vpop.f32.mrb[13].mxu1 }
 0x1dd   :  { %v561_v29 = vpop.f32.mrb[14].mxu1 }
 0x1de   :  { %v1058_v30 = vpop.f32.mrb[15].mxu1 }
 0x1e3   :  { %v662_v31 = vpop.f32.mrb[24].mxu0 }
 0x1e4   :  { %v663_v32 = vadd.f32 %v662_v31, %v558_v27  ;;  %v1085_v33 = vpop.f32.mrb[25].mxu0 }
 0x1e5   :  { %v665_v34 = vpop.f32.mrb[26].mxu0 }
 0x1e6   :  { %v666_v35 = vadd.f32 %v665_v34, %v561_v29  ;;  %v1086_v36 = vpop.f32.mrb[27].mxu0  ;;  %v183_v34 = vadd.f32 %v868_v59, %v1394_v20 }
 0x1e9   :  { %v566_v37 = vpop.f32.mrb[16].mxu1 }
 0x1ea   :  { %v1061_v38 = vpop.f32.mrb[17].mxu1 }
 0x1eb   :  { %v670_v39 = vpop.f32.mrb[28].mxu0  ;;  %v569_v40 = vpop.f32.mrb[18].mxu1 }
 0x1ec   :  { %v671_v41 = vadd.f32 %v670_v39, %v566_v37  ;;  %v1089_v42 = vpop.f32.mrb[29].mxu0  ;;  %v1062_v1 = vpop.f32.mrb[19].mxu1 }
 0x1ed   :  { %v673_v43 = vpop.f32.mrb[30].mxu0 }
 0x1ee   :  { %v674_v44 = vadd.f32 %v673_v43, %v569_v40  ;;  %v1090_v45 = vpop.f32.mrb[31].mxu0 }
 0x1f1   :  { %v574_v46 = vpop.f32.mrb[20].mxu1 }
 0x1f2   :  { %v1065_v47 = vpop.f32.mrb[21].mxu1 }
 0x1f3   :  { %v678_v48 = vpop.f32.mrb[32].mxu0  ;;  %v577_v49 = vpop.f32.mrb[22].mxu1 }
 0x1f4   :  { %v679_v50 = vadd.f32 %v678_v48, %v574_v46  ;;  %v1093_v51 = vpop.f32.mrb[33].mxu0  ;;  %v1066_v52 = vpop.f32.mrb[23].mxu1 }
 0x1f5   :  { %v681_v53 = vpop.f32.mrb[34].mxu0 }
 0x1f6   :  { %v1094_v54 = vpop.f32.mrb[35].mxu0 }
 0x1fb   :  { %v791_v55 = vpop.f32.mrb[24].mxu1 }
 0x1fc   :  { %v813_v57 = vadd.f32 %v791_v55, %v663_v32  ;;  %v1113_v58 = vpop.f32.mrb[25].mxu1 }
 0x1fd   :  { %v794_v60 = vpop.f32.mrb[26].mxu1 }
 0x1fe   :  { %v825_v61 = vadd.f32 %v948_v56, %v813_v57  ;;  %v814_v62 = vadd.f32 %v794_v60, %v666_v35  ;;  %v1114_v63 = vpop.f32.mrb[27].mxu1 }
 0x200   :  { %v830_v3 = vmax.f32 %v825_v61, 0.0  ;;  %v826_v4 = vadd.f32 %v948_v56, %v814_v62 }
 0x202   :  { %v835_v7 = vadd.f32 %v830_v3, %v179_v2  ;;  %v831_v8 = vmax.f32 %v826_v4, 0.0 }
 0x203   :  { %v799_v9 = vpop.f32.mrb[28].mxu1 }
 0x204   :  { %v840_v10 = vmax.f32 %v835_v7, 0.0  ;;  %v836_v12 = vadd.f32 %v831_v8, %v180_v5  ;;  %v815_v13 = vadd.f32 %v799_v9, %v671_v41  ;;  %v1117_v14 = vpop.f32.mrb[29].mxu1 }
 0x205   :  { %v802_v15 = vpop.f32.mrb[30].mxu1 }
 0x206   :  { %845 = vst [vmem:[%s1477_s7] sm:$0xff] %v840_v10  ;;  %v841_v17 = vmax.f32 %v836_v12, 0.0  ;;  %v827_v18 = vadd.f32 %v948_v56, %v815_v13  ;;  %v816_v19 = vadd.f32 %v802_v15, %v674_v44  ;;  %v1118_v0 = vpop.f32.mrb[31].mxu1 }
 0x208   :  { %846 = vst [vmem:[%s1477_s7 + $0x8] sm:$0xff] %v841_v17  ;;  %v832_v6 = vmax.f32 %v827_v18, 0.0  ;;  %v828_v22 = vadd.f32 %v948_v56, %v816_v19 }
 0x20a   :  { %v837_v24 = vadd.f32 %v832_v6, %v181_v21  ;;  %v833_v25 = vmax.f32 %v828_v22, 0.0 }
 0x20b   :  { %v807_v26 = vpop.f32.mrb[32].mxu1 }
 0x20c   :  { %v842_v27 = vmax.f32 %v837_v24, 0.0  ;;  %v838_v28 = vadd.f32 %v833_v25, %v182_v23  ;;  %v817_v29 = vadd.f32 %v807_v26, %v679_v50  ;;  %v1121_v30 = vpop.f32.mrb[33].mxu1 }
 0x20d   :  { %v810_v31 = vpop.f32.mrb[34].mxu1 }
 0x20e   :  { %949 = vst [vmem:[%s1477_s7 + $0xe] sm:$0xfc] %v842_v27  ;;  %v843_v11 = vmax.f32 %v838_v28, 0.0  ;;  %v829_v32 = vadd.f32 %v948_v56, %v817_v29  ;;  %v1122_v33 = vpop.f32.mrb[35].mxu1 }
 0x210   :  { %950 = vst [vmem:[%s1477_s7 + $0x16] sm:$0xff] %v843_v11  ;;  %v834_v16 = vmax.f32 %v829_v32, 0.0 }
 0x212   :  { %v839_v35 = vadd.f32 %v834_v16, %v183_v34 }
 0x214   :  { %v844_v36 = vmax.f32 %v839_v35, 0.0 }
 0x216   :  { %951 = vst [vmem:[%s1477_s7 + $0x1e] sm:$0x3] %v844_v36 }

</bundles_post_ra>
